<compile_context>
chip_gen: v7x
topology: tpu7x:2x2x1
jax: 0.10.0
libtpu: 0.0.40
codegen_flags: <defaults>
</compile_context>

<pallas_src>
import functools

import jax
import jax.numpy as jnp
from jax import lax
from jax.experimental import pallas as pl
from jax.experimental.pallas import tpu as pltpu


def _gather_tile_kernel(ids_ref, table_ref, out_ref, scratch_ref, sem_ref, *,
                        tile_m, n_dma):
    """Gather `tile_m` rows of the HBM table into a dense (tile_m, D) output tile.

    ids_ref     : SMEM int32 ids (scalar prefetch), full padded id vector.
    table_ref   : full (V, D) table left in HBM (memory_space=pl.ANY).
    scratch_ref : (tile_m, D) VMEM staging buffer.
    sem_ref     : DMA semaphore ring of depth n_dma (n_dma row fetches in flight).
    """
    base = pl.program_id(0) * tile_m

    def issue(t, slot):
        row = ids_ref[base + t]
        pltpu.make_async_copy(
            table_ref.at[pl.ds(row, 1), :],
            scratch_ref.at[pl.ds(t, 1), :],
            sem_ref.at[slot],
        ).start()

    def wait_slot(slot):
        # Only shape + semaphore matter for the wait descriptor.
        pltpu.make_async_copy(
            table_ref.at[pl.ds(0, 1), :],
            scratch_ref.at[pl.ds(0, 1), :],
            sem_ref.at[slot],
        ).wait()

    n_prime = min(tile_m, n_dma)

    # Warm-up: put the first n_prime row DMAs in flight (static, tiny unroll).
    for t in range(n_prime):
        issue(t, t % n_dma)

    # Steady state: retire the oldest DMA on this slot, then reuse the slot.
    def steady(t, carry):
        slot = lax.rem(t, n_dma)
        wait_slot(slot)
        issue(t, slot)
        return carry

    lax.fori_loop(n_prime, tile_m, steady, 0)

    # Drain: exactly one DMA is still pending on each of the n_prime used slots.
    for slot in range(n_prime):
        wait_slot(slot)

    # One dense (tile_m, D) store -> lane/sublane-dense output block writeback.
    out_ref[...] = scratch_ref[...]


def _round_up(x, m):
    return (x + m - 1) // m * m


# Keep the scalar-prefetched id vector comfortably inside SMEM for long sequences.
_MAX_TOKENS_PER_CALL = 1 << 15


def _lookup_chunk(ids_flat, table, tile_m, n_dma):
    n = ids_flat.shape[0]
    _, d = table.shape
    # Don't over-tile tiny inputs; keep the row count a multiple of 8 sublanes.
    tile_m = max(8, min(tile_m, _round_up(n, 8)))
    n_pad = _round_up(n, tile_m)
    ids_padded = jnp.pad(ids_flat.astype(jnp.int32), (0, n_pad - n))  # pad with row 0

    kernel = functools.partial(_gather_tile_kernel, tile_m=tile_m, n_dma=n_dma)
    out = pl.pallas_call(
        kernel,
        out_shape=jax.ShapeDtypeStruct((n_pad, d), table.dtype),
        grid_spec=pltpu.PrefetchScalarGridSpec(
            num_scalar_prefetch=1,                        # ids -> SMEM before the grid
            grid=(n_pad // tile_m,),
            in_specs=[pl.BlockSpec(memory_space=pl.ANY)],  # table stays in HBM
            out_specs=pl.BlockSpec((tile_m, d), lambda i, ids: (i, 0)),
            scratch_shapes=[
                pltpu.VMEM((tile_m, d), table.dtype),
                pltpu.SemaphoreType.DMA((n_dma,)),
            ],
        ),
        compiler_params=pltpu.CompilerParams(
            # tokens are independent -> shard across both TensorCores on v7x
            dimension_semantics=("parallel",),
        ),
    )(ids_padded, table)
    return out[:n]


def embedding_lookup_pallas(ids_flat, table, *, tile_m=128, n_dma=8):
    """Gather rows of `table` at `ids_flat` (1-D int) -> (N, D)."""
    n = int(ids_flat.shape[0])
    if n <= _MAX_TOKENS_PER_CALL:
        return _lookup_chunk(ids_flat, table, tile_m, n_dma)
    parts = []
    for start in range(0, n, _MAX_TOKENS_PER_CALL):
        parts.append(
            _lookup_chunk(ids_flat[start:start + _MAX_TOKENS_PER_CALL],
                          table, tile_m, n_dma))
    return jnp.concatenate(parts, axis=0)


class GraphEmbedding:
    """JAX/Pallas port of models/prompt.py::GraphEmbedding (forward only)."""

    def __init__(self, original_weight, new_embedding, pad_token_id, num_labels,
                 graph_type=''):
        self.graph_type = graph_type
        self.padding_idx = pad_token_id   # forward: plain gather (padding affects grads only)
        self.num_class = num_labels
        self.original_weight = original_weight                      # (V_orig, D)
        zero_row = jnp.zeros((1, new_embedding.shape[-1]), new_embedding.dtype)
        # nn.Embedding.from_pretrained(cat([zeros(1, D), new_embedding]))
        self.new_weight = jnp.concatenate([zero_row, new_embedding], axis=0)
        self.size = self.original_weight.shape[0] + self.new_weight.shape[0] - 1
        self.depth = self.new_weight.shape[0] - 2 - self.num_class
        # graph_type == '' has no per-call transform, so build the combined (V, D)
        # table once instead of re-concatenating (a full V*D HBM round trip) per call.
        # TODO(synk): GraphEncoder (GAT/GCN) transform for graph_type != '' is not
        # defined in the provided source; only the graph_type == '' path is implemented.
        self._table = jnp.concatenate(
            [self.original_weight, self.new_weight[1:, :]], axis=0)

    def weight(self):
        return self._table

    def raw_weight(self):
        return jnp.concatenate([self.original_weight, self.new_weight[1:, :]], axis=0)

    def __call__(self, x):
        table = self.weight()                                       # (V, D)
        b, s = x.shape
        flat = x.reshape(-1)
        out = embedding_lookup_pallas(flat, table)                  # (B*S, D)
        return out.reshape(b, s, table.shape[-1])


if __name__ == "__main__":
    key = jax.random.PRNGKey(0)
    k_orig, k_new, k_ids = jax.random.split(key, 3)

    # Small, module-consistent shapes.
    v_orig, d = 32, 32          # original (pretrained) embedding table
    n_new = 8                   # label-tree / edge embeddings (before zero-row prepend)
    num_labels = 3
    pad_token_id = 0
    batch, seq = 2, 8

    original_weight = jax.random.normal(k_orig, (v_orig, d), dtype=jnp.float32)
    new_embedding = jax.random.normal(k_new, (n_new, d), dtype=jnp.float32)

    model = GraphEmbedding(original_weight, new_embedding,
                           pad_token_id=pad_token_id, num_labels=num_labels,
                           graph_type='')

    # token ids in [0, size); include the padding id to exercise that path
    x = jax.random.randint(k_ids, (batch, seq), 0, model.size, dtype=jnp.int32)
    x = x.at[0, 0].set(pad_token_id)

    out = model(x)
    out = jax.block_until_ready(out)

    # sanity check against a plain-JAX reference gather
    ref = jnp.take(model.weight(), x, axis=0)
    assert out.shape == (batch, seq, d), out.shape
    assert jnp.allclose(out, ref), "Pallas gather mismatch vs reference"

    print("KERNEL_OK")
</pallas_src>

<mosaic_0001>
module attributes {stable_mosaic.version = 11 : i64} {
  func.func @_gather_tile_kernel(%arg0: i32, %arg1: memref<16xi32, #tpu.memory_space<smem>>, %arg2: memref<40x32xf32, #tpu.memory_space<any>>, %arg3: memref<16x32xf32, #tpu.memory_space<vmem>>, %arg4: memref<16x32xf32, #tpu.memory_space<vmem>>, %arg5: memref<8x!tpu.dma_semaphore, #tpu.memory_space<semaphore_mem>>) attributes {dimension_semantics = [#tpu.dimension_semantics<parallel>], iteration_bounds = array<i64: 1>, scalar_prefetch = 1 : i64, scratch_operands = 2 : i64, tpu.core_type = #tpu.core_type<tc>, window_params = [{}, {transform_indices = @transform_1, window_bounds = array<i64: 16, 32>}]} {
    %c16_i32 = arith.constant 16 : i32
    %0 = arith.muli %arg0, %c16_i32 : i32
    %c0_i32 = arith.constant 0 : i32
    %1 = arith.addi %0, %c0_i32 : i32
    %2 = arith.index_cast %1 : i32 to index
    %3 = memref.load %arg1[%2] : memref<16xi32, #tpu.memory_space<smem>>
    %c0_i32_0 = arith.constant 0 : i32
    %c0_i32_1 = arith.constant 0 : i32
    %4 = tpu.memref_slice %arg2[%3, %c0_i32_1] : memref<40x32xf32, #tpu.memory_space<any>> -> memref<1x32xf32, #tpu.memory_space<any>>
    %c0_i32_2 = arith.constant 0 : i32
    %c0_i32_3 = arith.constant 0 : i32
    %5 = tpu.memref_slice %arg4[%c0_i32_2, %c0_i32_3] : memref<16x32xf32, #tpu.memory_space<vmem>> -> memref<1x32xf32, #tpu.memory_space<vmem>>
    %6 = tpu.memref_slice %arg5[%c0_i32_0] : memref<8x!tpu.dma_semaphore, #tpu.memory_space<semaphore_mem>> -> memref<1x!tpu.dma_semaphore, #tpu.memory_space<semaphore_mem>>
    %7 = tpu.memref_squeeze %6 : memref<1x!tpu.dma_semaphore, #tpu.memory_space<semaphore_mem>> -> memref<!tpu.dma_semaphore, #tpu.memory_space<semaphore_mem>>
    tpu.enqueue_dma source(%4 : memref<1x32xf32, #tpu.memory_space<any>>) target(%5 : memref<1x32xf32, #tpu.memory_space<vmem>>) target_semaphore(%7 : memref<!tpu.dma_semaphore, #tpu.memory_space<semaphore_mem>>)
    %c1_i32 = arith.constant 1 : i32
    %8 = arith.addi %0, %c1_i32 : i32
    %9 = arith.index_cast %8 : i32 to index
    %10 = memref.load %arg1[%9] : memref<16xi32, #tpu.memory_space<smem>>
    %c1_i32_4 = arith.constant 1 : i32
    %c0_i32_5 = arith.constant 0 : i32
    %11 = tpu.memref_slice %arg2[%10, %c0_i32_5] : memref<40x32xf32, #tpu.memory_space<any>> -> memref<1x32xf32, #tpu.memory_space<any>>
    %c1_i32_6 = arith.constant 1 : i32
    %c0_i32_7 = arith.constant 0 : i32
    %12 = tpu.memref_slice %arg4[%c1_i32_6, %c0_i32_7] : memref<16x32xf32, #tpu.memory_space<vmem>> -> memref<1x32xf32, #tpu.memory_space<vmem>>
    %13 = tpu.memref_slice %arg5[%c1_i32_4] : memref<8x!tpu.dma_semaphore, #tpu.memory_space<semaphore_mem>> -> memref<1x!tpu.dma_semaphore, #tpu.memory_space<semaphore_mem>>
    %14 = tpu.memref_squeeze %13 : memref<1x!tpu.dma_semaphore, #tpu.memory_space<semaphore_mem>> -> memref<!tpu.dma_semaphore, #tpu.memory_space<semaphore_mem>>
    tpu.enqueue_dma source(%11 : memref<1x32xf32, #tpu.memory_space<any>>) target(%12 : memref<1x32xf32, #tpu.memory_space<vmem>>) target_semaphore(%14 : memref<!tpu.dma_semaphore, #tpu.memory_space<semaphore_mem>>)
    %c2_i32 = arith.constant 2 : i32
    %15 = arith.addi %0, %c2_i32 : i32
    %16 = arith.index_cast %15 : i32 to index
    %17 = memref.load %arg1[%16] : memref<16xi32, #tpu.memory_space<smem>>
    %c2_i32_8 = arith.constant 2 : i32
    %c0_i32_9 = arith.constant 0 : i32
    %18 = tpu.memref_slice %arg2[%17, %c0_i32_9] : memref<40x32xf32, #tpu.memory_space<any>> -> memref<1x32xf32, #tpu.memory_space<any>>
    %c2_i32_10 = arith.constant 2 : i32
    %c0_i32_11 = arith.constant 0 : i32
    %19 = tpu.memref_slice %arg4[%c2_i32_10, %c0_i32_11] : memref<16x32xf32, #tpu.memory_space<vmem>> -> memref<1x32xf32, #tpu.memory_space<vmem>>
    %20 = tpu.memref_slice %arg5[%c2_i32_8] : memref<8x!tpu.dma_semaphore, #tpu.memory_space<semaphore_mem>> -> memref<1x!tpu.dma_semaphore, #tpu.memory_space<semaphore_mem>>
    %21 = tpu.memref_squeeze %20 : memref<1x!tpu.dma_semaphore, #tpu.memory_space<semaphore_mem>> -> memref<!tpu.dma_semaphore, #tpu.memory_space<semaphore_mem>>
    tpu.enqueue_dma source(%18 : memref<1x32xf32, #tpu.memory_space<any>>) target(%19 : memref<1x32xf32, #tpu.memory_space<vmem>>) target_semaphore(%21 : memref<!tpu.dma_semaphore, #tpu.memory_space<semaphore_mem>>)
    %c3_i32 = arith.constant 3 : i32
    %22 = arith.addi %0, %c3_i32 : i32
    %23 = arith.index_cast %22 : i32 to index
    %24 = memref.load %arg1[%23] : memref<16xi32, #tpu.memory_space<smem>>
    %c3_i32_12 = arith.constant 3 : i32
    %c0_i32_13 = arith.constant 0 : i32
    %25 = tpu.memref_slice %arg2[%24, %c0_i32_13] : memref<40x32xf32, #tpu.memory_space<any>> -> memref<1x32xf32, #tpu.memory_space<any>>
    %c3_i32_14 = arith.constant 3 : i32
    %c0_i32_15 = arith.constant 0 : i32
    %26 = tpu.memref_slice %arg4[%c3_i32_14, %c0_i32_15] : memref<16x32xf32, #tpu.memory_space<vmem>> -> memref<1x32xf32, #tpu.memory_space<vmem>>
    %27 = tpu.memref_slice %arg5[%c3_i32_12] : memref<8x!tpu.dma_semaphore, #tpu.memory_space<semaphore_mem>> -> memref<1x!tpu.dma_semaphore, #tpu.memory_space<semaphore_mem>>
    %28 = tpu.memref_squeeze %27 : memref<1x!tpu.dma_semaphore, #tpu.memory_space<semaphore_mem>> -> memref<!tpu.dma_semaphore, #tpu.memory_space<semaphore_mem>>
    tpu.enqueue_dma source(%25 : memref<1x32xf32, #tpu.memory_space<any>>) target(%26 : memref<1x32xf32, #tpu.memory_space<vmem>>) target_semaphore(%28 : memref<!tpu.dma_semaphore, #tpu.memory_space<semaphore_mem>>)
    %c4_i32 = arith.constant 4 : i32
    %29 = arith.addi %0, %c4_i32 : i32
    %30 = arith.index_cast %29 : i32 to index
    %31 = memref.load %arg1[%30] : memref<16xi32, #tpu.memory_space<smem>>
    %c4_i32_16 = arith.constant 4 : i32
    %c0_i32_17 = arith.constant 0 : i32
    %32 = tpu.memref_slice %arg2[%31, %c0_i32_17] : memref<40x32xf32, #tpu.memory_space<any>> -> memref<1x32xf32, #tpu.memory_space<any>>
    %c4_i32_18 = arith.constant 4 : i32
    %c0_i32_19 = arith.constant 0 : i32
    %33 = tpu.memref_slice %arg4[%c4_i32_18, %c0_i32_19] : memref<16x32xf32, #tpu.memory_space<vmem>> -> memref<1x32xf32, #tpu.memory_space<vmem>>
    %34 = tpu.memref_slice %arg5[%c4_i32_16] : memref<8x!tpu.dma_semaphore, #tpu.memory_space<semaphore_mem>> -> memref<1x!tpu.dma_semaphore, #tpu.memory_space<semaphore_mem>>
    %35 = tpu.memref_squeeze %34 : memref<1x!tpu.dma_semaphore, #tpu.memory_space<semaphore_mem>> -> memref<!tpu.dma_semaphore, #tpu.memory_space<semaphore_mem>>
    tpu.enqueue_dma source(%32 : memref<1x32xf32, #tpu.memory_space<any>>) target(%33 : memref<1x32xf32, #tpu.memory_space<vmem>>) target_semaphore(%35 : memref<!tpu.dma_semaphore, #tpu.memory_space<semaphore_mem>>)
    %c5_i32 = arith.constant 5 : i32
    %36 = arith.addi %0, %c5_i32 : i32
    %37 = arith.index_cast %36 : i32 to index
    %38 = memref.load %arg1[%37] : memref<16xi32, #tpu.memory_space<smem>>
    %c5_i32_20 = arith.constant 5 : i32
    %c0_i32_21 = arith.constant 0 : i32
    %39 = tpu.memref_slice %arg2[%38, %c0_i32_21] : memref<40x32xf32, #tpu.memory_space<any>> -> memref<1x32xf32, #tpu.memory_space<any>>
    %c5_i32_22 = arith.constant 5 : i32
    %c0_i32_23 = arith.constant 0 : i32
    %40 = tpu.memref_slice %arg4[%c5_i32_22, %c0_i32_23] : memref<16x32xf32, #tpu.memory_space<vmem>> -> memref<1x32xf32, #tpu.memory_space<vmem>>
    %41 = tpu.memref_slice %arg5[%c5_i32_20] : memref<8x!tpu.dma_semaphore, #tpu.memory_space<semaphore_mem>> -> memref<1x!tpu.dma_semaphore, #tpu.memory_space<semaphore_mem>>
    %42 = tpu.memref_squeeze %41 : memref<1x!tpu.dma_semaphore, #tpu.memory_space<semaphore_mem>> -> memref<!tpu.dma_semaphore, #tpu.memory_space<semaphore_mem>>
    tpu.enqueue_dma source(%39 : memref<1x32xf32, #tpu.memory_space<any>>) target(%40 : memref<1x32xf32, #tpu.memory_space<vmem>>) target_semaphore(%42 : memref<!tpu.dma_semaphore, #tpu.memory_space<semaphore_mem>>)
    %c6_i32 = arith.constant 6 : i32
    %43 = arith.addi %0, %c6_i32 : i32
    %44 = arith.index_cast %43 : i32 to index
    %45 = memref.load %arg1[%44] : memref<16xi32, #tpu.memory_space<smem>>
    %c6_i32_24 = arith.constant 6 : i32
    %c0_i32_25 = arith.constant 0 : i32
    %46 = tpu.memref_slice %arg2[%45, %c0_i32_25] : memref<40x32xf32, #tpu.memory_space<any>> -> memref<1x32xf32, #tpu.memory_space<any>>
    %c6_i32_26 = arith.constant 6 : i32
    %c0_i32_27 = arith.constant 0 : i32
    %47 = tpu.memref_slice %arg4[%c6_i32_26, %c0_i32_27] : memref<16x32xf32, #tpu.memory_space<vmem>> -> memref<1x32xf32, #tpu.memory_space<vmem>>
    %48 = tpu.memref_slice %arg5[%c6_i32_24] : memref<8x!tpu.dma_semaphore, #tpu.memory_space<semaphore_mem>> -> memref<1x!tpu.dma_semaphore, #tpu.memory_space<semaphore_mem>>
    %49 = tpu.memref_squeeze %48 : memref<1x!tpu.dma_semaphore, #tpu.memory_space<semaphore_mem>> -> memref<!tpu.dma_semaphore, #tpu.memory_space<semaphore_mem>>
    tpu.enqueue_dma source(%46 : memref<1x32xf32, #tpu.memory_space<any>>) target(%47 : memref<1x32xf32, #tpu.memory_space<vmem>>) target_semaphore(%49 : memref<!tpu.dma_semaphore, #tpu.memory_space<semaphore_mem>>)
    %c7_i32 = arith.constant 7 : i32
    %50 = arith.addi %0, %c7_i32 : i32
    %51 = arith.index_cast %50 : i32 to index
    %52 = memref.load %arg1[%51] : memref<16xi32, #tpu.memory_space<smem>>
    %c7_i32_28 = arith.constant 7 : i32
    %c0_i32_29 = arith.constant 0 : i32
    %53 = tpu.memref_slice %arg2[%52, %c0_i32_29] : memref<40x32xf32, #tpu.memory_space<any>> -> memref<1x32xf32, #tpu.memory_space<any>>
    %c7_i32_30 = arith.constant 7 : i32
    %c0_i32_31 = arith.constant 0 : i32
    %54 = tpu.memref_slice %arg4[%c7_i32_30, %c0_i32_31] : memref<16x32xf32, #tpu.memory_space<vmem>> -> memref<1x32xf32, #tpu.memory_space<vmem>>
    %55 = tpu.memref_slice %arg5[%c7_i32_28] : memref<8x!tpu.dma_semaphore, #tpu.memory_space<semaphore_mem>> -> memref<1x!tpu.dma_semaphore, #tpu.memory_space<semaphore_mem>>
    %56 = tpu.memref_squeeze %55 : memref<1x!tpu.dma_semaphore, #tpu.memory_space<semaphore_mem>> -> memref<!tpu.dma_semaphore, #tpu.memory_space<semaphore_mem>>
    tpu.enqueue_dma source(%53 : memref<1x32xf32, #tpu.memory_space<any>>) target(%54 : memref<1x32xf32, #tpu.memory_space<vmem>>) target_semaphore(%56 : memref<!tpu.dma_semaphore, #tpu.memory_space<semaphore_mem>>)
    %c8_i32 = arith.constant 8 : i32
    %c8_i32_32 = arith.constant 8 : i32
    %57 = arith.addi %c8_i32, %c8_i32_32 : i32
    %c1_i32_33 = arith.constant 1 : i32
    scf.for %arg6 = %c8_i32 to %57 step %c1_i32_33  : i32 {
      %c8_i32_78 = arith.constant 8 : i32
      %92 = arith.remsi %arg6, %c8_i32_78 : i32
      %c0_i32_79 = arith.constant 0 : i32
      %c0_i32_80 = arith.constant 0 : i32
      %93 = tpu.memref_slice %arg2[%c0_i32_79, %c0_i32_80] : memref<40x32xf32, #tpu.memory_space<any>> -> memref<1x32xf32, #tpu.memory_space<any>>
      %c0_i32_81 = arith.constant 0 : i32
      %c0_i32_82 = arith.constant 0 : i32
      %94 = tpu.memref_slice %arg4[%c0_i32_81, %c0_i32_82] : memref<16x32xf32, #tpu.memory_space<vmem>> -> memref<1x32xf32, #tpu.memory_space<vmem>>
      %95 = tpu.memref_slice %arg5[%92] : memref<8x!tpu.dma_semaphore, #tpu.memory_space<semaphore_mem>> -> memref<1x!tpu.dma_semaphore, #tpu.memory_space<semaphore_mem>>
      %96 = tpu.memref_squeeze %95 : memref<1x!tpu.dma_semaphore, #tpu.memory_space<semaphore_mem>> -> memref<!tpu.dma_semaphore, #tpu.memory_space<semaphore_mem>>
      tpu.wait_dma2 semaphore(%96 : memref<!tpu.dma_semaphore, #tpu.memory_space<semaphore_mem>>) src(%93 : memref<1x32xf32, #tpu.memory_space<any>>) dst(%94 : memref<1x32xf32, #tpu.memory_space<vmem>>)
      %97 = arith.addi %0, %arg6 : i32
      %98 = arith.index_cast %97 : i32 to index
      %99 = memref.load %arg1[%98] : memref<16xi32, #tpu.memory_space<smem>>
      %c0_i32_83 = arith.constant 0 : i32
      %100 = tpu.memref_slice %arg2[%99, %c0_i32_83] : memref<40x32xf32, #tpu.memory_space<any>> -> memref<1x32xf32, #tpu.memory_space<any>>
      %c0_i32_84 = arith.constant 0 : i32
      %101 = tpu.memref_slice %arg4[%arg6, %c0_i32_84] : memref<16x32xf32, #tpu.memory_space<vmem>> -> memref<1x32xf32, #tpu.memory_space<vmem>>
      %102 = tpu.memref_slice %arg5[%92] : memref<8x!tpu.dma_semaphore, #tpu.memory_space<semaphore_mem>> -> memref<1x!tpu.dma_semaphore, #tpu.memory_space<semaphore_mem>>
      %103 = tpu.memref_squeeze %102 : memref<1x!tpu.dma_semaphore, #tpu.memory_space<semaphore_mem>> -> memref<!tpu.dma_semaphore, #tpu.memory_space<semaphore_mem>>
      tpu.enqueue_dma source(%100 : memref<1x32xf32, #tpu.memory_space<any>>) target(%101 : memref<1x32xf32, #tpu.memory_space<vmem>>) target_semaphore(%103 : memref<!tpu.dma_semaphore, #tpu.memory_space<semaphore_mem>>)
    }
    %c8_i32_34 = arith.constant 8 : i32
    %c0_i32_35 = arith.constant 0 : i32
    %c0_i32_36 = arith.constant 0 : i32
    %c0_i32_37 = arith.constant 0 : i32
    %58 = tpu.memref_slice %arg2[%c0_i32_36, %c0_i32_37] : memref<40x32xf32, #tpu.memory_space<any>> -> memref<1x32xf32, #tpu.memory_space<any>>
    %c0_i32_38 = arith.constant 0 : i32
    %c0_i32_39 = arith.constant 0 : i32
    %59 = tpu.memref_slice %arg4[%c0_i32_38, %c0_i32_39] : memref<16x32xf32, #tpu.memory_space<vmem>> -> memref<1x32xf32, #tpu.memory_space<vmem>>
    %60 = tpu.memref_slice %arg5[%c0_i32_35] : memref<8x!tpu.dma_semaphore, #tpu.memory_space<semaphore_mem>> -> memref<1x!tpu.dma_semaphore, #tpu.memory_space<semaphore_mem>>
    %61 = tpu.memref_squeeze %60 : memref<1x!tpu.dma_semaphore, #tpu.memory_space<semaphore_mem>> -> memref<!tpu.dma_semaphore, #tpu.memory_space<semaphore_mem>>
    tpu.wait_dma2 semaphore(%61 : memref<!tpu.dma_semaphore, #tpu.memory_space<semaphore_mem>>) src(%58 : memref<1x32xf32, #tpu.memory_space<any>>) dst(%59 : memref<1x32xf32, #tpu.memory_space<vmem>>)
    %c1_i32_40 = arith.constant 1 : i32
    %c0_i32_41 = arith.constant 0 : i32
    %c0_i32_42 = arith.constant 0 : i32
    %62 = tpu.memref_slice %arg2[%c0_i32_41, %c0_i32_42] : memref<40x32xf32, #tpu.memory_space<any>> -> memref<1x32xf32, #tpu.memory_space<any>>
    %c0_i32_43 = arith.constant 0 : i32
    %c0_i32_44 = arith.constant 0 : i32
    %63 = tpu.memref_slice %arg4[%c0_i32_43, %c0_i32_44] : memref<16x32xf32, #tpu.memory_space<vmem>> -> memref<1x32xf32, #tpu.memory_space<vmem>>
    %64 = tpu.memref_slice %arg5[%c1_i32_40] : memref<8x!tpu.dma_semaphore, #tpu.memory_space<semaphore_mem>> -> memref<1x!tpu.dma_semaphore, #tpu.memory_space<semaphore_mem>>
    %65 = tpu.memref_squeeze %64 : memref<1x!tpu.dma_semaphore, #tpu.memory_space<semaphore_mem>> -> memref<!tpu.dma_semaphore, #tpu.memory_space<semaphore_mem>>
    tpu.wait_dma2 semaphore(%65 : memref<!tpu.dma_semaphore, #tpu.memory_space<semaphore_mem>>) src(%62 : memref<1x32xf32, #tpu.memory_space<any>>) dst(%63 : memref<1x32xf32, #tpu.memory_space<vmem>>)
    %c2_i32_45 = arith.constant 2 : i32
    %c0_i32_46 = arith.constant 0 : i32
    %c0_i32_47 = arith.constant 0 : i32
    %66 = tpu.memref_slice %arg2[%c0_i32_46, %c0_i32_47] : memref<40x32xf32, #tpu.memory_space<any>> -> memref<1x32xf32, #tpu.memory_space<any>>
    %c0_i32_48 = arith.constant 0 : i32
    %c0_i32_49 = arith.constant 0 : i32
    %67 = tpu.memref_slice %arg4[%c0_i32_48, %c0_i32_49] : memref<16x32xf32, #tpu.memory_space<vmem>> -> memref<1x32xf32, #tpu.memory_space<vmem>>
    %68 = tpu.memref_slice %arg5[%c2_i32_45] : memref<8x!tpu.dma_semaphore, #tpu.memory_space<semaphore_mem>> -> memref<1x!tpu.dma_semaphore, #tpu.memory_space<semaphore_mem>>
    %69 = tpu.memref_squeeze %68 : memref<1x!tpu.dma_semaphore, #tpu.memory_space<semaphore_mem>> -> memref<!tpu.dma_semaphore, #tpu.memory_space<semaphore_mem>>
    tpu.wait_dma2 semaphore(%69 : memref<!tpu.dma_semaphore, #tpu.memory_space<semaphore_mem>>) src(%66 : memref<1x32xf32, #tpu.memory_space<any>>) dst(%67 : memref<1x32xf32, #tpu.memory_space<vmem>>)
    %c3_i32_50 = arith.constant 3 : i32
    %c0_i32_51 = arith.constant 0 : i32
    %c0_i32_52 = arith.constant 0 : i32
    %70 = tpu.memref_slice %arg2[%c0_i32_51, %c0_i32_52] : memref<40x32xf32, #tpu.memory_space<any>> -> memref<1x32xf32, #tpu.memory_space<any>>
    %c0_i32_53 = arith.constant 0 : i32
    %c0_i32_54 = arith.constant 0 : i32
    %71 = tpu.memref_slice %arg4[%c0_i32_53, %c0_i32_54] : memref<16x32xf32, #tpu.memory_space<vmem>> -> memref<1x32xf32, #tpu.memory_space<vmem>>
    %72 = tpu.memref_slice %arg5[%c3_i32_50] : memref<8x!tpu.dma_semaphore, #tpu.memory_space<semaphore_mem>> -> memref<1x!tpu.dma_semaphore, #tpu.memory_space<semaphore_mem>>
    %73 = tpu.memref_squeeze %72 : memref<1x!tpu.dma_semaphore, #tpu.memory_space<semaphore_mem>> -> memref<!tpu.dma_semaphore, #tpu.memory_space<semaphore_mem>>
    tpu.wait_dma2 semaphore(%73 : memref<!tpu.dma_semaphore, #tpu.memory_space<semaphore_mem>>) src(%70 : memref<1x32xf32, #tpu.memory_space<any>>) dst(%71 : memref<1x32xf32, #tpu.memory_space<vmem>>)
    %c4_i32_55 = arith.constant 4 : i32
    %c0_i32_56 = arith.constant 0 : i32
    %c0_i32_57 = arith.constant 0 : i32
    %74 = tpu.memref_slice %arg2[%c0_i32_56, %c0_i32_57] : memref<40x32xf32, #tpu.memory_space<any>> -> memref<1x32xf32, #tpu.memory_space<any>>
    %c0_i32_58 = arith.constant 0 : i32
    %c0_i32_59 = arith.constant 0 : i32
    %75 = tpu.memref_slice %arg4[%c0_i32_58, %c0_i32_59] : memref<16x32xf32, #tpu.memory_space<vmem>> -> memref<1x32xf32, #tpu.memory_space<vmem>>
    %76 = tpu.memref_slice %arg5[%c4_i32_55] : memref<8x!tpu.dma_semaphore, #tpu.memory_space<semaphore_mem>> -> memref<1x!tpu.dma_semaphore, #tpu.memory_space<semaphore_mem>>
    %77 = tpu.memref_squeeze %76 : memref<1x!tpu.dma_semaphore, #tpu.memory_space<semaphore_mem>> -> memref<!tpu.dma_semaphore, #tpu.memory_space<semaphore_mem>>
    tpu.wait_dma2 semaphore(%77 : memref<!tpu.dma_semaphore, #tpu.memory_space<semaphore_mem>>) src(%74 : memref<1x32xf32, #tpu.memory_space<any>>) dst(%75 : memref<1x32xf32, #tpu.memory_space<vmem>>)
    %c5_i32_60 = arith.constant 5 : i32
    %c0_i32_61 = arith.constant 0 : i32
    %c0_i32_62 = arith.constant 0 : i32
    %78 = tpu.memref_slice %arg2[%c0_i32_61, %c0_i32_62] : memref<40x32xf32, #tpu.memory_space<any>> -> memref<1x32xf32, #tpu.memory_space<any>>
    %c0_i32_63 = arith.constant 0 : i32
    %c0_i32_64 = arith.constant 0 : i32
    %79 = tpu.memref_slice %arg4[%c0_i32_63, %c0_i32_64] : memref<16x32xf32, #tpu.memory_space<vmem>> -> memref<1x32xf32, #tpu.memory_space<vmem>>
    %80 = tpu.memref_slice %arg5[%c5_i32_60] : memref<8x!tpu.dma_semaphore, #tpu.memory_space<semaphore_mem>> -> memref<1x!tpu.dma_semaphore, #tpu.memory_space<semaphore_mem>>
    %81 = tpu.memref_squeeze %80 : memref<1x!tpu.dma_semaphore, #tpu.memory_space<semaphore_mem>> -> memref<!tpu.dma_semaphore, #tpu.memory_space<semaphore_mem>>
    tpu.wait_dma2 semaphore(%81 : memref<!tpu.dma_semaphore, #tpu.memory_space<semaphore_mem>>) src(%78 : memref<1x32xf32, #tpu.memory_space<any>>) dst(%79 : memref<1x32xf32, #tpu.memory_space<vmem>>)
    %c6_i32_65 = arith.constant 6 : i32
    %c0_i32_66 = arith.constant 0 : i32
    %c0_i32_67 = arith.constant 0 : i32
    %82 = tpu.memref_slice %arg2[%c0_i32_66, %c0_i32_67] : memref<40x32xf32, #tpu.memory_space<any>> -> memref<1x32xf32, #tpu.memory_space<any>>
    %c0_i32_68 = arith.constant 0 : i32
    %c0_i32_69 = arith.constant 0 : i32
    %83 = tpu.memref_slice %arg4[%c0_i32_68, %c0_i32_69] : memref<16x32xf32, #tpu.memory_space<vmem>> -> memref<1x32xf32, #tpu.memory_space<vmem>>
    %84 = tpu.memref_slice %arg5[%c6_i32_65] : memref<8x!tpu.dma_semaphore, #tpu.memory_space<semaphore_mem>> -> memref<1x!tpu.dma_semaphore, #tpu.memory_space<semaphore_mem>>
    %85 = tpu.memref_squeeze %84 : memref<1x!tpu.dma_semaphore, #tpu.memory_space<semaphore_mem>> -> memref<!tpu.dma_semaphore, #tpu.memory_space<semaphore_mem>>
    tpu.wait_dma2 semaphore(%85 : memref<!tpu.dma_semaphore, #tpu.memory_space<semaphore_mem>>) src(%82 : memref<1x32xf32, #tpu.memory_space<any>>) dst(%83 : memref<1x32xf32, #tpu.memory_space<vmem>>)
    %c7_i32_70 = arith.constant 7 : i32
    %c0_i32_71 = arith.constant 0 : i32
    %c0_i32_72 = arith.constant 0 : i32
    %86 = tpu.memref_slice %arg2[%c0_i32_71, %c0_i32_72] : memref<40x32xf32, #tpu.memory_space<any>> -> memref<1x32xf32, #tpu.memory_space<any>>
    %c0_i32_73 = arith.constant 0 : i32
    %c0_i32_74 = arith.constant 0 : i32
    %87 = tpu.memref_slice %arg4[%c0_i32_73, %c0_i32_74] : memref<16x32xf32, #tpu.memory_space<vmem>> -> memref<1x32xf32, #tpu.memory_space<vmem>>
    %88 = tpu.memref_slice %arg5[%c7_i32_70] : memref<8x!tpu.dma_semaphore, #tpu.memory_space<semaphore_mem>> -> memref<1x!tpu.dma_semaphore, #tpu.memory_space<semaphore_mem>>
    %89 = tpu.memref_squeeze %88 : memref<1x!tpu.dma_semaphore, #tpu.memory_space<semaphore_mem>> -> memref<!tpu.dma_semaphore, #tpu.memory_space<semaphore_mem>>
    tpu.wait_dma2 semaphore(%89 : memref<!tpu.dma_semaphore, #tpu.memory_space<semaphore_mem>>) src(%86 : memref<1x32xf32, #tpu.memory_space<any>>) dst(%87 : memref<1x32xf32, #tpu.memory_space<vmem>>)
    %c0 = arith.constant 0 : index
    %c0_75 = arith.constant 0 : index
    %90 = vector.load %arg4[%c0, %c0_75] : memref<16x32xf32, #tpu.memory_space<vmem>>, vector<16x32xf32>
    %c0_76 = arith.constant 0 : index
    %c0_77 = arith.constant 0 : index
    %91 = vector.load %arg3[%c0_76, %c0_77] : memref<16x32xf32, #tpu.memory_space<vmem>>, vector<16x32xf32>
    tpu.vector_store %arg3[%c0_76, %c0_77], %90 {strides = array<i32>} : memref<16x32xf32, #tpu.memory_space<vmem>>, vector<16x32xf32>,
    return
  }
  func.func @transform_1(%arg0: i32, %arg1: memref<16xi32, #tpu.memory_space<smem>>) -> (i32, i32) {
    %c0_i32 = arith.constant 0 : i32
    %c0_i32_0 = arith.constant 0 : i32
    return %arg0, %c0_i32 : i32, i32
  }
}

</mosaic_0001>

<bundles_post_ra>
// kernel: tpu_custom_call.1
= control target key start
LH: loop header
LB: loop body
LE: loop exit
PB: predicated region body
PF: predicated region fallthrough
CT: control target
= control target key end

     0   :  { %s827_s0 = inlined_call_operand.vmem [shape: s32[16], index: 0, kind: input, shape index: {}]   ;;  %s828_s1 = inlined_call_operand.vmem [shape: f32[40,32], index: 1, kind: input, shape index: {}]   ;;  %s829_s2 = inlined_call_operand.hbm [shape: f32[16,32], index: 2, kind: output, shape index: {}]  }
   0x1   :  { %s7_s11 = sshll.u32 %s827_s0, 4  ;;  %s8_s11 = int_to_ptr.vmem [resolvable:$true] %s7_s11 }
   0x2   :  { %s702_s12 = scalar_lea.vmem %s8_s11, 16  ;;  %p707_p1 = scmp.lt.s32.totalorder %s8_s11, %s8_s11 }
   0x3   :  { %p703_p0 = scmp.ne.s32.totalorder %s8_s11, %s702_s12  ;;  %p708_p2 = scmp.lt.s32.totalorder %s702_s12, %s702_s12 }
   0x5   :  { %p709_p3 = por %p708_p2, %p707_p1 }
   0x7   :  { %p710_p4 = pnand %p709_p3, %p703_p0 }
   0x9   :  { %713 = shalt.err (!%p710_p4)  }
   0xa   :  { %s766_s13 = smov [#allocation5]  }
   0xb   :  { %10 = dma.vmem_to_smem %s8_s11, 16, %s766_s13, [#allocation4] }
   0xc   :  { %740 = dma.done.wait [#allocation4], 16 }
   0xd   :  { %741 = vsyncadd [#allocation4], 4294967280 }
   0xe   :  { %12 = sfence }
   0xf   :  { %13 = vsyncpa [#allocation7], 0  ;;  %s15_s14 = sld [smem:[#allocation5]] }
  0x15   :  { %s16_s17 = scalar_lea.vmem %s828_s1, %s15_s14 }
  0x16   :  { %v34_v0 = vld [vmem:[%s16_s17] sm:$0x1] }
  0x17   :  { %35 = vst [vmem:[#allocation2] sm:$0x1] %v34_v0 }
  0x18   :  { %60 = vsyncadd [#allocation3], 16  ;;  %s674_s0 = sld [smem:[#allocation5 + $0x1]] }
  0x1e   :  { %s63_s20 = scalar_lea.vmem %s828_s1, %s674_s0 }
  0x1f   :  { %v83_v1 = vld [vmem:[%s63_s20] sm:$0x1] }
  0x20   :  { %84 = vst [vmem:[#allocation2 + $0x1] sm:$0x1] %v83_v1 }
  0x21   :  { %109 = vsyncadd [#allocation3 + $0x1], 16  ;;  %s675_s21 = sld [smem:[#allocation5 + $0x2]] }
  0x27   :  { %s112_s24 = scalar_lea.vmem %s828_s1, %s675_s21 }
  0x28   :  { %v132_v2 = vld [vmem:[%s112_s24] sm:$0x1] }
  0x29   :  { %133 = vst [vmem:[#allocation2 + $0x2] sm:$0x1] %v132_v2 }
  0x2a   :  { %158 = vsyncadd [#allocation3 + $0x2], 16  ;;  %s676_s25 = sld [smem:[#allocation5 + $0x3]] }
  0x30   :  { %s161_s28 = scalar_lea.vmem %s828_s1, %s676_s25 }
  0x31   :  { %v181_v3 = vld [vmem:[%s161_s28] sm:$0x1] }
  0x32   :  { %182 = vst [vmem:[#allocation2 + $0x3] sm:$0x1] %v181_v3 }
  0x33   :  { %207 = vsyncadd [#allocation3 + $0x3], 16  ;;  %s677_s29 = sld [smem:[#allocation5 + $0x4]] }
  0x39   :  { %s210_s4 = scalar_lea.vmem %s828_s1, %s677_s29 }
  0x3a   :  { %v230_v4 = vld [vmem:[%s210_s4] sm:$0x1] }
  0x3b   :  { %231 = vst [vmem:[#allocation2 + $0x4] sm:$0x1] %v230_v4 }
  0x3c   :  { %256 = vsyncadd [#allocation3 + $0x4], 16  ;;  %s678_s5 = sld [smem:[#allocation5 + $0x5]] }
  0x42   :  { %s259_s8 = scalar_lea.vmem %s828_s1, %s678_s5 }
  0x43   :  { %v279_v5 = vld [vmem:[%s259_s8] sm:$0x1] }
  0x44   :  { %280 = vst [vmem:[#allocation2 + $0x5] sm:$0x1] %v279_v5 }
  0x45   :  { %305 = vsyncadd [#allocation3 + $0x5], 16  ;;  %s679_s9 = sld [smem:[#allocation5 + $0x6]] }
  0x4b   :  { %s308_s12 = scalar_lea.vmem %s828_s1, %s679_s9 }
  0x4c   :  { %v328_v6 = vld [vmem:[%s308_s12] sm:$0x1] }
  0x4d   :  { %329 = vst [vmem:[#allocation2 + $0x6] sm:$0x1] %v328_v6 }
  0x4e   :  { %354 = vsyncadd [#allocation3 + $0x6], 16  ;;  %s680_s13 = sld [smem:[#allocation5 + $0x7]] }
  0x54   :  { %s357_s16 = scalar_lea.vmem %s828_s1, %s680_s13 }
  0x55   :  { %v377_v7 = vld [vmem:[%s357_s16] sm:$0x1] }
  0x56   :  { %378 = vst [vmem:[#allocation2 + $0x7] sm:$0x1] %v377_v7 }
  0x57   :  { %403 = vsyncadd [#allocation3 + $0x7], 16  ;;  %s762_s17 = smov 8  }
  0x58 LB: > { %p410_p5 = scmp.lt.s32.totalorder %s764_s17, 0  ;;  %s411_s0 = ssub.s32 0, %s764_s17  ;;  %s764_s17 = sphi %s762_s17, %s409_s17  }
  0x59   : > { %s681_s18 = smin.u32 %s764_s17, %s411_s0 }
  0x5a   : > { %s413_s19 = sand.u32 7, %s681_s18  }
  0x5b   : > { %s414_s20 = ssub.s32 0, %s413_s19 }
  0x5c   : > { %s831_s20 = smov (!%p410_p5, %s414_s20), %s413_s19 }
  0x5d   : > { %s416_s21 = scalar_lea.sflag [#allocation3], %s831_s20 }
  0x5e   : > { %742 = dma.done.wait %s416_s21, 16 }
  0x5f   : > { %743 = vsyncadd %s416_s21, 4294967280  ;;  %s421_s22 = sld [smem:[#allocation5 + %s764_s17]]  ;;  %s423_s26 = scalar_lea.vmem [#allocation2], %s764_s17 }
  0x65   : > { %s422_s25 = scalar_lea.vmem %s828_s1, %s421_s22 }
  0x66   : > { %v441_v8 = vld [vmem:[%s422_s25] sm:$0x1] }
  0x67   : > { %442 = vst [vmem:[%s423_s26] sm:$0x1] %v441_v8 }
  0x68   : > { %467 = vsyncadd %s416_s21, 16  ;;  %s409_s17 = sadd.s32 1, %s764_s17  }
  0x69   : > { %p406_p6 = scmp.ge.s32.totalorder %s409_s17, 16  }
  0x6b   :  { %408 = sbr.rel (!%p406_p6) target bundleno = 88 (0x58), region = 419 }
  0x72   :  { %744 = dma.done.wait [#allocation3], 16 }
  0x73   :  { %745 = vsyncadd [#allocation3], 4294967280 }
  0x74   :  { %746 = dma.done.wait [#allocation3 + $0x1], 16 }
  0x75   :  { %747 = vsyncadd [#allocation3 + $0x1], 4294967280 }
  0x76   :  { %748 = dma.done.wait [#allocation3 + $0x2], 16 }
  0x77   :  { %749 = vsyncadd [#allocation3 + $0x2], 4294967280 }
  0x78   :  { %750 = dma.done.wait [#allocation3 + $0x3], 16 }
  0x79   :  { %751 = vsyncadd [#allocation3 + $0x3], 4294967280 }
  0x7a   :  { %752 = dma.done.wait [#allocation3 + $0x4], 16 }
  0x7b   :  { %753 = vsyncadd [#allocation3 + $0x4], 4294967280 }
  0x7c   :  { %754 = dma.done.wait [#allocation3 + $0x5], 16 }
  0x7d   :  { %755 = vsyncadd [#allocation3 + $0x5], 4294967280 }
  0x7e   :  { %756 = dma.done.wait [#allocation3 + $0x6], 16 }
  0x7f   :  { %757 = vsyncadd [#allocation3 + $0x6], 4294967280 }
  0x80   :  { %758 = dma.done.wait [#allocation3 + $0x7], 16 }
  0x81   :  { %759 = vsyncadd [#allocation3 + $0x7], 4294967280  ;;  %s767_s27 = smov [#allocation6]   ;;  %vm487_vm0 = vcmask 261120   ;;  %v485_v9 = vld [vmem:[#allocation2] sm:$0xff]  ;;  %v486_v10 = vld [vmem:[#allocation2 + $0x8] sm:$0xff] }
  0x82   :  { %s495_s28 = sshll.u32 %s767_s27, 4  ;;  %488 = vst.msk [vmem:[#allocation6] sm:$0xff] %vm487_vm0, %v485_v9  ;;  %489 = vst.msk [vmem:[#allocation6 + $0x8] sm:$0xff] %vm487_vm0, %v486_v10  ;;  %s496_s28 = int_to_ptr.vmem [resolvable:$true] %s495_s28 }
  0x83   :  { %s714_s1 = scalar_lea.vmem %s496_s28, 256  ;;  %p719_p8 = scmp.lt.s32.totalorder %s496_s28, %s496_s28 }
  0x84   :  { %p715_p7 = scmp.ne.s32.totalorder %s496_s28, %s714_s1  ;;  %p720_p9 = scmp.lt.s32.totalorder %s714_s1, %s714_s1 }
  0x86   :  { %p721_p10 = por %p720_p9, %p719_p8 }
  0x88   :  { %p722_p11 = pnand %p721_p10, %p715_p7 }
  0x8a   :  { %725 = shalt.err (!%p722_p11)
}
  0x8b   :  { %s726_s3 = scalar_lea.hbm %s829_s2, 256 }
  0x8c   :  { %p727_p12 = scmp.ne.s32.totalorder %s829_s2, %s726_s3  ;;  %p730_p13 = scmp.lt.u32.totalorder %s726_s3, %s829_s2 }
  0x8e   :  { %p732_p0 = pnand %p730_p13, %p727_p12 }
  0x90   :  { %735 = shalt.err (!%p732_p0)
}
  0x91   :  { %s768_s8 = smov 128   ;;  %s769_s9 = smov 8  }
  0x92   :  { %501 = dma.vmem_to_hbm [thread:$0]  %s496_s28, 256, %s829_s2, [#allocation7], %s768_s8, %s768_s8, %s769_s9  }
  0x93   :  { %760 = dma.done.wait [#allocation7], 256  }
  0x94   :  { %761 = vsyncadd [#allocation7], 4294967040 }
  0x95   :  { %505 = vsyncpa [#allocation7], 1 }
  0x96   :  { %506 = vsyncmov [#allocation3] }
  0x99   :  { %s507_s12 = vpop.sfrf %506 }
  0x9a   :  { %p682_p1 = scmp.ne.s32.totalorder %s507_s12, 0 }
  0x9c   :  { %511 = shalt.err (%p682_p1)  }
  0x9d   :  { %513 = vsyncmov [#allocation3 + $0x1] }
  0xa0   :  { %s514_s13 = vpop.sfrf %513 }
  0xa1   :  { %p683_p2 = scmp.ne.s32.totalorder %s514_s13, 0 }
  0xa3   :  { %518 = shalt.err (%p683_p2)  }
  0xa4   :  { %520 = vsyncmov [#allocation3 + $0x2] }
  0xa7   :  { %s521_s14 = vpop.sfrf %520 }
  0xa8   :  { %p684_p3 = scmp.ne.s32.totalorder %s521_s14, 0 }
  0xaa   :  { %525 = shalt.err (%p684_p3)  }
  0xab   :  { %527 = vsyncmov [#allocation3 + $0x3] }
  0xae   :  { %s528_s15 = vpop.sfrf %527 }
  0xaf   :  { %p685_p4 = scmp.ne.s32.totalorder %s528_s15, 0 }
  0xb1   :  { %532 = shalt.err (%p685_p4)  }
  0xb2   :  { %534 = vsyncmov [#allocation3 + $0x4] }
  0xb5   :  { %s535_s2 = vpop.sfrf %534 }
  0xb6   :  { %p686_p5 = scmp.ne.s32.totalorder %s535_s2, 0 }
  0xb8   :  { %539 = shalt.err (%p686_p5)  }
  0xb9   :  { %541 = vsyncmov [#allocation3 + $0x5] }
  0xbc   :  { %s542_s16 = vpop.sfrf %541 }
  0xbd   :  { %p687_p6 = scmp.ne.s32.totalorder %s542_s16, 0 }
  0xbf   :  { %546 = shalt.err (%p687_p6)  }
  0xc0   :  { %548 = vsyncmov [#allocation3 + $0x6] }
  0xc3   :  { %s549_s17 = vpop.sfrf %548 }
  0xc4   :  { %p688_p7 = scmp.ne.s32.totalorder %s549_s17, 0 }
  0xc6   :  { %553 = shalt.err (%p688_p7)  }
  0xc7   :  { %555 = vsyncmov [#allocation3 + $0x7] }
  0xca   :  { %s556_s0 = vpop.sfrf %555 }
  0xcb   :  { %p689_p8 = scmp.ne.s32.totalorder %s556_s0, 0 }
  0xcd   :  { %560 = shalt.err (%p689_p8)  }

</bundles_post_ra>
